<compile_context>
chip_gen: v5e
topology: v5e:2x2
jax: 0.10.0
libtpu: 0.0.40
codegen_flags: <defaults>
</compile_context>

<pallas_src>
import functools

import jax
import jax.numpy as jnp
from jax.experimental import pallas as pl
from jax.experimental.pallas import tpu as pltpu

BN_EPS = 1e-5


def _round_up(x, m):
    return ((x + m - 1) // m) * m


def _mlp_kernel(n_layers, num_classes, x_ref, scale_ref, shift_ref, w0_ref, *rest):
    """Fused MLP on one batch tile.

    rest = [wstk_ref (n_layers-1, P, P)]  (only if n_layers > 1)
           + [b_ref (n_layers, 1, P), out_ref (tile_b, num_classes)]
    Layer i's Linear already has layer i+1's BN affine folded in (wrapper),
    so only layer 0's BN appears explicitly.
    """
    if n_layers > 1:
        wstk_ref, b_ref, out_ref = rest
    else:
        b_ref, out_ref = rest

    h = x_ref[...].astype(jnp.float32)                                   # (tile_b, D0)
    h = jnp.maximum(h * scale_ref[...] + shift_ref[...], 0.0)            # BN0 + ReLU   (VPU)
    h = jnp.dot(h, w0_ref[...], preferred_element_type=jnp.float32) + b_ref[0]   # fc0 (+BN1)
    for i in range(1, n_layers):                                         # static unroll
        h = jnp.maximum(h, 0.0)                                          # ReLU         (VPU)
        h = jnp.dot(h, wstk_ref[i - 1],
                    preferred_element_type=jnp.float32) + b_ref[i]       # fc_i (+BN_{i+1}) (MXU)
    out_ref[...] = h[:, :num_classes].astype(out_ref.dtype)


def _fold_params(params, D0):
    """Fold eval-mode BN into affines / the preceding Linear and pad once.

    Returns (scale0, shift0, w0, wstk_or_None, bstk, P)."""
    L = len(params)
    assert params[0]["weight"].shape[1] == D0

    scales, shifts = [], []
    for p in params:
        s = (p["gamma"] / jnp.sqrt(p["var"] + BN_EPS)).astype(jnp.float32)
        t = (p["beta"] - p["mean"] * s).astype(jnp.float32)
        scales.append(s)
        shifts.append(t)

    # Uniform padded lane width for every layer output (hidden & final).
    P = _round_up(max(p["weight"].shape[0] for p in params), 128)

    scale0 = scales[0].reshape(1, D0)
    shift0 = shifts[0].reshape(1, D0)

    ws, bs = [], []
    for i, p in enumerate(params):
        w = p["weight"].T.astype(jnp.float32)          # torch (out, in) -> (in, out)
        b = p["bias"].astype(jnp.float32)
        if i + 1 < L:                                  # fold next layer's BN column-wise
            w = w * scales[i + 1][None, :]
            b = b * scales[i + 1] + shifts[i + 1]
        din, dout = w.shape
        din_pad = D0 if i == 0 else P
        wp = jnp.zeros((din_pad, P), jnp.float32).at[:din, :dout].set(w)
        bp = jnp.zeros((1, P), jnp.float32).at[0, :dout].set(b)
        ws.append(wp)
        bs.append(bp)

    w0 = ws[0]                                         # (D0, P)
    wstk = jnp.stack(ws[1:], axis=0) if L > 1 else None  # (L-1, P, P)
    bstk = jnp.stack(bs, axis=0)                       # (L, 1, P)
    return scale0, shift0, w0, wstk, bstk, P


def _reference(feature, params):
    """Pure-JAX mirror of the PyTorch forward (eval-mode BN)."""
    x = feature.reshape(feature.shape[0], -1).astype(jnp.float32)
    for p in params:
        scale = p["gamma"] / jnp.sqrt(p["var"] + BN_EPS)
        h = (x - p["mean"]) * scale + p["beta"]
        h = jnp.maximum(h, 0.0)
        x = h @ p["weight"].T + p["bias"]
    return x


def vanilla_regression_forward(feature, params, *, row_tile=1024, min_kernel_batch=16):
    """feature: (B, ...) array.  params: list of per-layer dicts with keys
    gamma, beta, mean, var (BatchNorm1d, eval stats) and weight (out,in), bias (Linear).
    Returns (B, num_classes) float32, matching the PyTorch module's forward."""
    B = feature.shape[0]

    # Tiny batches: pallas_call fixed cost dominates — let XLA fuse it.
    if B < min_kernel_batch:
        return _reference(feature, params)

    x = feature.reshape(B, -1)                         # out = feature.reshape(B, -1)
    D0 = x.shape[1]
    L = len(params)
    num_classes = params[-1]["weight"].shape[0]

    scale0, shift0, w0, wstk, bstk, P = _fold_params(params, D0)

    # Batch tiling: big tiles amortize per-step overhead, but cap at ~B/2 so the
    # "parallel" grid axis has >= 2 steps (keeps both v7x TensorCores busy).
    half = _round_up((B + 1) // 2, 8)
    tile_b = max(8, min(row_tile, half))
    grid = (pl.cdiv(B, tile_b),)                       # Pallas clips the partial last block

    in_arrays = [x, scale0, shift0, w0]
    in_specs = [
        pl.BlockSpec((tile_b, D0), lambda i: (i, 0)),
        pl.BlockSpec((1, D0), lambda i: (0, 0)),
        pl.BlockSpec((1, D0), lambda i: (0, 0)),
        pl.BlockSpec((D0, P), lambda i: (0, 0)),
    ]
    if L > 1:
        in_arrays.append(wstk)
        in_specs.append(pl.BlockSpec(wstk.shape, lambda i: (0, 0, 0)))
    in_arrays.append(bstk)
    in_specs.append(pl.BlockSpec(bstk.shape, lambda i: (0, 0, 0)))

    out = pl.pallas_call(
        functools.partial(_mlp_kernel, L, num_classes),
        out_shape=jax.ShapeDtypeStruct((B, num_classes), jnp.float32),
        grid_spec=pltpu.PrefetchScalarGridSpec(
            num_scalar_prefetch=0,
            grid=grid,
            in_specs=in_specs,
            out_specs=pl.BlockSpec((tile_b, num_classes), lambda i: (i, 0)),
        ),
        compiler_params=pltpu.CompilerParams(
            dimension_semantics=("parallel",)),
    )(*in_arrays)

    return out


def _make_params(key, input_dim, hidden_dim, num_classes, n_layers):
    dims = [input_dim] + [hidden_dim] * (n_layers - 1) + [num_classes]
    params = []
    for i in range(n_layers):
        din, dout = dims[i], dims[i + 1]
        key, k1, k2, k3, k4, k5, k6 = jax.random.split(key, 7)
        params.append(dict(
            gamma=jax.random.normal(k1, (din,), jnp.float32) * 0.1 + 1.0,
            beta=jax.random.normal(k2, (din,), jnp.float32) * 0.1,
            mean=jax.random.normal(k3, (din,), jnp.float32) * 0.1,
            var=jnp.abs(jax.random.normal(k4, (din,), jnp.float32)) * 0.1 + 0.9,
            weight=jax.random.normal(k5, (dout, din), jnp.float32) / jnp.sqrt(din),
            bias=jax.random.normal(k6, (dout,), jnp.float32) * 0.1,
        ))
    return params


if __name__ == "__main__":
    key = jax.random.PRNGKey(0)
    # module defaults: input_dim=50, hidden_dim=100, n_layers=5, num_classes=10
    B, input_dim, hidden_dim, num_classes, n_layers = 24, 50, 100, 10, 5

    kf, kp = jax.random.split(key)
    feature = jax.random.normal(kf, (B, 5, 10), dtype=jnp.float32)   # reshaped to (B, 50)
    params = _make_params(kp, input_dim, hidden_dim, num_classes, n_layers)

    # Pallas path (B >= min_kernel_batch): 2 grid steps, last block partial.
    out = vanilla_regression_forward(feature, params)
    out = jax.block_until_ready(out)

    ref = _reference(feature, params)
    assert out.shape == (B, num_classes) and out.dtype == jnp.float32
    assert bool(jnp.allclose(out, ref, rtol=1e-3, atol=1e-3))

    # Tiny-batch fallback path sanity check.
    small = jax.block_until_ready(vanilla_regression_forward(feature[:4], params))
    assert bool(jnp.allclose(small, ref[:4], rtol=1e-3, atol=1e-3))

    print("KERNEL_OK")
</pallas_src>

<mosaic_0001>
module attributes {stable_mosaic.version = 11 : i64} {
  func.func @_mlp_kernel(%arg0: i32, %arg1: memref<16x50xf32, #tpu.memory_space<vmem>>, %arg2: memref<1x50xf32, #tpu.memory_space<vmem>>, %arg3: memref<1x50xf32, #tpu.memory_space<vmem>>, %arg4: memref<50x128xf32, #tpu.memory_space<vmem>>, %arg5: memref<4x128x128xf32, #tpu.memory_space<vmem>>, %arg6: memref<5x1x128xf32, #tpu.memory_space<vmem>>, %arg7: memref<16x10xf32, #tpu.memory_space<vmem>>) attributes {dimension_semantics = [#tpu.dimension_semantics<parallel>], iteration_bounds = array<i64: 2>, scalar_prefetch = 0 : i64, scratch_operands = 0 : i64, tpu.core_type = #tpu.core_type<tc>, window_params = [{transform_indices = @transform_0, window_bounds = array<i64: 16, 50>}, {pipeline_mode = #tpu.pipeline_mode<synchronous>, transform_indices = @transform_1, window_bounds = array<i64: 1, 50>}, {pipeline_mode = #tpu.pipeline_mode<synchronous>, transform_indices = @transform_2, window_bounds = array<i64: 1, 50>}, {pipeline_mode = #tpu.pipeline_mode<synchronous>, transform_indices = @transform_3, window_bounds = array<i64: 50, 128>}, {pipeline_mode = #tpu.pipeline_mode<synchronous>, transform_indices = @transform_4, window_bounds = array<i64: 4, 128, 128>}, {pipeline_mode = #tpu.pipeline_mode<synchronous>, transform_indices = @transform_5, window_bounds = array<i64: 5, 1, 128>}, {transform_indices = @transform_6, window_bounds = array<i64: 16, 10>}]} {
    %c0 = arith.constant 0 : index
    %c0_0 = arith.constant 0 : index
    %0 = vector.load %arg1[%c0, %c0_0] : memref<16x50xf32, #tpu.memory_space<vmem>>, vector<16x50xf32>
    %c0_1 = arith.constant 0 : index
    %c0_2 = arith.constant 0 : index
    %1 = vector.load %arg2[%c0_1, %c0_2] : memref<1x50xf32, #tpu.memory_space<vmem>>, vector<1x50xf32>
    %2 = vector.broadcast %1 : vector<1x50xf32> to vector<16x50xf32>
    %3 = arith.mulf %0, %2 : vector<16x50xf32>
    %c0_3 = arith.constant 0 : index
    %c0_4 = arith.constant 0 : index
    %4 = vector.load %arg3[%c0_3, %c0_4] : memref<1x50xf32, #tpu.memory_space<vmem>>, vector<1x50xf32>
    %5 = vector.broadcast %4 : vector<1x50xf32> to vector<16x50xf32>
    %6 = arith.addf %3, %5 : vector<16x50xf32>
    %cst = arith.constant 0.000000e+00 : f32
    %7 = vector.broadcast %cst : f32 to vector<16x50xf32>
    %8 = arith.maximumf %6, %7 : vector<16x50xf32>
    %c0_5 = arith.constant 0 : index
    %c0_6 = arith.constant 0 : index
    %9 = vector.load %arg4[%c0_5, %c0_6] : memref<50x128xf32, #tpu.memory_space<vmem>>, vector<50x128xf32>
    %cst_7 = arith.constant dense<0.000000e+00> : vector<16x128xf32>
    %10 = tpu.matmul %8, %9, %cst_7 {dimension_numbers = #tpu.dot_dimension_numbers<[1], [0], [0], [1], [0, 0, 1, 1], [], []>} : vector<16x50xf32>, vector<50x128xf32>, vector<16x128xf32> -> vector<16x128xf32>
    %c0_8 = arith.constant 0 : index
    %c0_9 = arith.constant 0 : index
    %c0_10 = arith.constant 0 : index
    %11 = vector.load %arg6[%c0_8, %c0_9, %c0_10] : memref<5x1x128xf32, #tpu.memory_space<vmem>>, vector<1x1x128xf32>
    %12 = vector.shape_cast %11 : vector<1x1x128xf32> to vector<1x128xf32>
    %13 = vector.broadcast %12 : vector<1x128xf32> to vector<16x128xf32>
    %14 = arith.addf %10, %13 : vector<16x128xf32>
    %cst_11 = arith.constant 0.000000e+00 : f32
    %15 = vector.broadcast %cst_11 : f32 to vector<16x128xf32>
    %16 = arith.maximumf %14, %15 : vector<16x128xf32>
    %c0_12 = arith.constant 0 : index
    %c0_13 = arith.constant 0 : index
    %c0_14 = arith.constant 0 : index
    %17 = vector.load %arg5[%c0_12, %c0_13, %c0_14] : memref<4x128x128xf32, #tpu.memory_space<vmem>>, vector<1x128x128xf32>
    %18 = vector.shape_cast %17 : vector<1x128x128xf32> to vector<128x128xf32>
    %cst_15 = arith.constant dense<0.000000e+00> : vector<16x128xf32>
    %19 = tpu.matmul %16, %18, %cst_15 {dimension_numbers = #tpu.dot_dimension_numbers<[1], [0], [0], [1], [0, 0, 1, 1], [], []>} : vector<16x128xf32>, vector<128x128xf32>, vector<16x128xf32> -> vector<16x128xf32>
    %c1 = arith.constant 1 : index
    %c0_16 = arith.constant 0 : index
    %c0_17 = arith.constant 0 : index
    %20 = vector.load %arg6[%c1, %c0_16, %c0_17] : memref<5x1x128xf32, #tpu.memory_space<vmem>>, vector<1x1x128xf32>
    %21 = vector.shape_cast %20 : vector<1x1x128xf32> to vector<1x128xf32>
    %22 = vector.broadcast %21 : vector<1x128xf32> to vector<16x128xf32>
    %23 = arith.addf %19, %22 : vector<16x128xf32>
    %cst_18 = arith.constant 0.000000e+00 : f32
    %24 = vector.broadcast %cst_18 : f32 to vector<16x128xf32>
    %25 = arith.maximumf %23, %24 : vector<16x128xf32>
    %c1_19 = arith.constant 1 : index
    %c0_20 = arith.constant 0 : index
    %c0_21 = arith.constant 0 : index
    %26 = vector.load %arg5[%c1_19, %c0_20, %c0_21] : memref<4x128x128xf32, #tpu.memory_space<vmem>>, vector<1x128x128xf32>
    %27 = vector.shape_cast %26 : vector<1x128x128xf32> to vector<128x128xf32>
    %cst_22 = arith.constant dense<0.000000e+00> : vector<16x128xf32>
    %28 = tpu.matmul %25, %27, %cst_22 {dimension_numbers = #tpu.dot_dimension_numbers<[1], [0], [0], [1], [0, 0, 1, 1], [], []>} : vector<16x128xf32>, vector<128x128xf32>, vector<16x128xf32> -> vector<16x128xf32>
    %c2 = arith.constant 2 : index
    %c0_23 = arith.constant 0 : index
    %c0_24 = arith.constant 0 : index
    %29 = vector.load %arg6[%c2, %c0_23, %c0_24] : memref<5x1x128xf32, #tpu.memory_space<vmem>>, vector<1x1x128xf32>
    %30 = vector.shape_cast %29 : vector<1x1x128xf32> to vector<1x128xf32>
    %31 = vector.broadcast %30 : vector<1x128xf32> to vector<16x128xf32>
    %32 = arith.addf %28, %31 : vector<16x128xf32>
    %cst_25 = arith.constant 0.000000e+00 : f32
    %33 = vector.broadcast %cst_25 : f32 to vector<16x128xf32>
    %34 = arith.maximumf %32, %33 : vector<16x128xf32>
    %c2_26 = arith.constant 2 : index
    %c0_27 = arith.constant 0 : index
    %c0_28 = arith.constant 0 : index
    %35 = vector.load %arg5[%c2_26, %c0_27, %c0_28] : memref<4x128x128xf32, #tpu.memory_space<vmem>>, vector<1x128x128xf32>
    %36 = vector.shape_cast %35 : vector<1x128x128xf32> to vector<128x128xf32>
    %cst_29 = arith.constant dense<0.000000e+00> : vector<16x128xf32>
    %37 = tpu.matmul %34, %36, %cst_29 {dimension_numbers = #tpu.dot_dimension_numbers<[1], [0], [0], [1], [0, 0, 1, 1], [], []>} : vector<16x128xf32>, vector<128x128xf32>, vector<16x128xf32> -> vector<16x128xf32>
    %c3 = arith.constant 3 : index
    %c0_30 = arith.constant 0 : index
    %c0_31 = arith.constant 0 : index
    %38 = vector.load %arg6[%c3, %c0_30, %c0_31] : memref<5x1x128xf32, #tpu.memory_space<vmem>>, vector<1x1x128xf32>
    %39 = vector.shape_cast %38 : vector<1x1x128xf32> to vector<1x128xf32>
    %40 = vector.broadcast %39 : vector<1x128xf32> to vector<16x128xf32>
    %41 = arith.addf %37, %40 : vector<16x128xf32>
    %cst_32 = arith.constant 0.000000e+00 : f32
    %42 = vector.broadcast %cst_32 : f32 to vector<16x128xf32>
    %43 = arith.maximumf %41, %42 : vector<16x128xf32>
    %c3_33 = arith.constant 3 : index
    %c0_34 = arith.constant 0 : index
    %c0_35 = arith.constant 0 : index
    %44 = vector.load %arg5[%c3_33, %c0_34, %c0_35] : memref<4x128x128xf32, #tpu.memory_space<vmem>>, vector<1x128x128xf32>
    %45 = vector.shape_cast %44 : vector<1x128x128xf32> to vector<128x128xf32>
    %cst_36 = arith.constant dense<0.000000e+00> : vector<16x128xf32>
    %46 = tpu.matmul %43, %45, %cst_36 {dimension_numbers = #tpu.dot_dimension_numbers<[1], [0], [0], [1], [0, 0, 1, 1], [], []>} : vector<16x128xf32>, vector<128x128xf32>, vector<16x128xf32> -> vector<16x128xf32>
    %c4 = arith.constant 4 : index
    %c0_37 = arith.constant 0 : index
    %c0_38 = arith.constant 0 : index
    %47 = vector.load %arg6[%c4, %c0_37, %c0_38] : memref<5x1x128xf32, #tpu.memory_space<vmem>>, vector<1x1x128xf32>
    %48 = vector.shape_cast %47 : vector<1x1x128xf32> to vector<1x128xf32>
    %49 = vector.broadcast %48 : vector<1x128xf32> to vector<16x128xf32>
    %50 = arith.addf %46, %49 : vector<16x128xf32>
    %51 = vector.extract_strided_slice %50 {offsets = [0, 0], sizes = [16, 10], strides = [1, 1]} : vector<16x128xf32> to vector<16x10xf32>
    %c0_39 = arith.constant 0 : index
    %c0_40 = arith.constant 0 : index
    %52 = vector.load %arg7[%c0_39, %c0_40] : memref<16x10xf32, #tpu.memory_space<vmem>>, vector<16x10xf32>
    tpu.vector_store %arg7[%c0_39, %c0_40], %51 {strides = array<i32>} : memref<16x10xf32, #tpu.memory_space<vmem>>, vector<16x10xf32>,
    return
  }
  func.func @transform_0(%arg0: i32) -> (i32, i32) {
    %c0_i32 = arith.constant 0 : i32
    %c0_i32_0 = arith.constant 0 : i32
    return %arg0, %c0_i32 : i32, i32
  }
  func.func @transform_1(%arg0: i32) -> (i32, i32) {
    %c0_i32 = arith.constant 0 : i32
    %c0_i32_0 = arith.constant 0 : i32
    %c0_i32_1 = arith.constant 0 : i32
    return %c0_i32, %c0_i32_0 : i32, i32
  }
  func.func @transform_2(%arg0: i32) -> (i32, i32) {
    %c0_i32 = arith.constant 0 : i32
    %c0_i32_0 = arith.constant 0 : i32
    %c0_i32_1 = arith.constant 0 : i32
    return %c0_i32, %c0_i32_0 : i32, i32
  }
  func.func @transform_3(%arg0: i32) -> (i32, i32) {
    %c0_i32 = arith.constant 0 : i32
    %c0_i32_0 = arith.constant 0 : i32
    %c0_i32_1 = arith.constant 0 : i32
    return %c0_i32, %c0_i32_0 : i32, i32
  }
  func.func @transform_4(%arg0: i32) -> (i32, i32, i32) {
    %c0_i32 = arith.constant 0 : i32
    %c0_i32_0 = arith.constant 0 : i32
    %c0_i32_1 = arith.constant 0 : i32
    %c0_i32_2 = arith.constant 0 : i32
    return %c0_i32, %c0_i32_0, %c0_i32_1 : i32, i32, i32
  }
  func.func @transform_5(%arg0: i32) -> (i32, i32, i32) {
    %c0_i32 = arith.constant 0 : i32
    %c0_i32_0 = arith.constant 0 : i32
    %c0_i32_1 = arith.constant 0 : i32
    %c0_i32_2 = arith.constant 0 : i32
    return %c0_i32, %c0_i32_0, %c0_i32_1 : i32, i32, i32
  }
  func.func @transform_6(%arg0: i32) -> (i32, i32) {
    %c0_i32 = arith.constant 0 : i32
    %c0_i32_0 = arith.constant 0 : i32
    return %arg0, %c0_i32 : i32, i32
  }
}

</mosaic_0001>

<bundles_post_ra>
// kernel: tpu_custom_call.1
= control target key start
LH: loop header
LB: loop body
LE: loop exit
PB: predicated region body
PF: predicated region fallthrough
CT: control target
= control target key end

     0   :  { %s1582_s0 = inlined_call_operand.hbm [shape: f32[24,50], index: 0, kind: input, shape index: {}]   ;;  %s1583_s1 = inlined_call_operand.hbm [shape: f32[1,50], index: 1, kind: input, shape index: {}]   ;;  %s1584_s2 = inlined_call_operand.vmem [shape: f32[1,50], index: 2, kind: input, shape index: {}]   ;;  %s1585_s3 = inlined_call_operand.hbm [shape: f32[50,128], index: 3, kind: input, shape index: {}]   ;;  %s1586_s4 = inlined_call_operand.hbm [shape: f32[4,128,128], index: 4, kind: input, shape index: {}]   ;;  %s1587_s5 = inlined_call_operand.hbm [shape: f32[5,1,128], index: 5, kind: input, shape index: {}]   ;;  %s1588_s6 = inlined_call_operand.vmem [shape: f32[24,10], index: 6, kind: output, shape index: {}]  }
   0x1   :  { %1590 = sst [smem:[#allocation14_spill]] %s1583_s1 }
   0x2   :  { %1591 = sst [smem:[#allocation15_spill]] %s1586_s4 }
   0x3   :  { %11 = vsyncpa [#allocation3], 0 }
   0x4   :  { %13 = vsyncpa [#allocation3 + $0x1], 0 }
   0x5   :  { %14 = vsyncpa [#allocation5], 0 }
   0x6   :  { %15 = vsyncpa [#allocation8], 0  ;;  %s1378_s21 = smov 0   ;;  %s1380_s22 = smov 0  }
   0x7   :  { %s1382_s23 = smov 0   ;;  %s1384_s24 = smov 0  }
   0x8 LB: > { %s1397_s25 = sadd.s32 4294967295, %s1298_s24   ;;  %s1400_s26 = sadd.s32 1, %s1298_s24   ;;  %s1298_s24 = sphi %s1384_s24, %s1607_s24   ;;  %s1294_s23 = sphi %s1382_s23, %s1606_s23   ;;  %s1290_s22 = sphi %s1380_s22, %s1605_s22   ;;  %s1286_s21 = sphi %s1378_s21, %s1604_s21  }
   0x9   : > { %s25_s27 = ssub.s32 %s1298_s24, %s1400_s26  ;;  %s28_s28 = sadd.s32 1, %s1294_s23 }
   0xa   : > { %p26_p0 = scmp.eq.s32.totalorder %s25_s27, 0  ;;  %p35_p1 = scmp.ne.s32.totalorder %s1294_s23, %s1290_s22 }
   0xb   : > { %p36_p2 = scmp.eq.s32.totalorder %s1298_s24, 0  ;;  %p41_p3 = scmp.ne.s32.totalorder %s1290_s22, %s1286_s21 }
   0xc   : > { %s1410_s29 = scalar_select %p26_p0, %s1294_s23, %s28_s28  }
   0xd   : > { %p1412_p4 = por %p36_p2, %p35_p1  ;;  %p1589_p5 = scmp.eq.s32.totalorder %s1397_s25, 0 }
   0xe   : > { %p170_p6 = scmp.eq.s32.totalorder %s1397_s25, 1  ;;  %p870_p7 = scmp.ge.s32.totalorder %s1298_s24, 1 }
   0xf   : > { %p1421_p8 = por %p1589_p5, %p41_p3  ;;  %p183_p9 = scmp.lt.s32.totalorder %s1298_s24, 3 }
  0x10   : > { %p1426_p10 = por %p170_p6, %p35_p1  ;;  %s1596_s1 = sld [smem:[#allocation14_spill]] }
  0x11   : > { %p1430_p11 = pnand %p870_p7, %p183_p9  ;;  %s1332_s13 = smov [#allocation4]  }
  0x12   : > { %s197_s14 = sshll.u32 %s1332_s13, 4  ;;  %s1598_s4 = sld [smem:[#allocation15_spill]]  ;;  %s198_s14 = int_to_ptr.vmem [resolvable:$true] %s197_s14 }
  0x13   : > { %p931_p12 = pneg %p1430_p11  ;;  %s1333_s19 = smov [#allocation7]  }
  0x14   : > { %s225_s20 = sshll.u32 %s1333_s19, 4  ;;  %s209_s28 = sshll.u32 %s1585_s3, 4  ;;  %s226_s20 = int_to_ptr.vmem [resolvable:$true] %s225_s20  ;;  %s210_s28 = int_to_ptr.hbm [resolvable:$true] %s209_s28 }
  0x15   : > { %p1441_p13 = pnand %p931_p12, %p1589_p5  ;;  %s1334_s10 = smov 128  }
  0x16   : > { %s195_s12 = sshll.u32 %s1596_s1, 4  ;;  %s1335_s11 = smov 8   ;;  %s196_s12 = int_to_ptr.hbm [resolvable:$true] %s195_s12 }
  0x17   : > { %934 = dma.hbm_to_vmem [thread:$0]  (!%p1441_p13), %s196_s12, 16, %s198_s14, [#allocation5]  }
  0x18   : > { %s223_s18 = sshll.u32 %s1598_s4, 4  ;;  %s237_s17 = sshll.u32 %s1587_s5, 4  ;;  %s224_s18 = int_to_ptr.hbm [resolvable:$true] %s223_s18  ;;  %s238_s17 = int_to_ptr.hbm [resolvable:$true] %s237_s17 }
  0x19   : > { %940 = dma.hbm_to_vmem [thread:$0]  (!%p1441_p13), %s224_s18, 8192, %s226_s20, [#allocation8], %s1334_s10, %s1334_s10, %s1335_s11  }
  0x1a   : > { %s1336_s1 = smov [#allocation6]   ;;  %s1337_s12 = smov [#allocation9]  }
  0x1b   : > { %s211_s4 = sshll.u32 %s1336_s1, 4  ;;  %s239_s14 = sshll.u32 %s1337_s12, 4  ;;  %s212_s4 = int_to_ptr.vmem [resolvable:$true] %s211_s4  ;;  %s240_s14 = int_to_ptr.vmem [resolvable:$true] %s239_s14 }
  0x1c   : > { %937 = dma.hbm_to_vmem [thread:$0]  (!%p1441_p13), %s210_s28, 896, %s212_s4, [#allocation5], %s1334_s10, %s1334_s10, %s1335_s11  }
  0x1d   : > { %s1338_s19 = smov 16   ;;  %s1339_s21 = smov 1  }
  0x1e   : > { %943 = dma.hbm_to_vmem [thread:$0]  (!%p1441_p13), %s238_s17, 80, %s240_s14, [#allocation8], %s1338_s19, %s1338_s19, %s1339_s21  }
  0x1f   : > { %p875_p0 = scmp.ge.s32.totalorder %s1298_s24, 2 }
  0x21   : > { %249 = sbr.rel (%p875_p0) target bundleno = 74 (0x4a), region = 36 }
  0x26   : > { %252 = sbr.rel (!%p1412_p4) target bundleno = 74 (0x4a), region = 40  ;;  %s253_s1 = sand.u32 (%p1412_p4), 1, %s1294_s23  }
  0x27   : > { %s877_s18 = sshll.u32 (%p1412_p4), %s1298_s24, 1  ;;  %s876_s20 = sshll.u32 (%p1412_p4), %s253_s1, 4 }
  0x28   : > { %s259_s27 = ssub.s32 (%p1412_p4), 3, %s877_s18  ;;  %s1470_s10 = scalar_lea.sflag (%p1412_p4), [#allocation3], %s253_s1 }
  0x29   : > { %p260_p1 = scmp.lt.s32.totalorder (%p1412_p4), %s259_s27, 2  ;;  %s257_s11 = scalar_lea.vmem (%p1412_p4), [#allocation2], %s876_s20 }
  0x2b   : > { %s1609_s27 = smov (!%p260_p1, %s259_s27), 2 }
  0x2c   : > { %s878_s4 = sshll.u32 %s1609_s27, 3 }
  0x2d   : > { %s263_s28 = ssub.s32 16, %s878_s4 }
  0x2e   : > { %s264_s15 = sshll.u32 %s263_s28, 4 }
  0x2f   : > { %265 = vsyncadd %s1470_s10, %s264_s15  ;;  %p1473_p2 = scmp.ne.s32.totalorder %s878_s4, 0  ;;  %s910_s13 = sshll.u32 %s1298_s24, 4 }
  0x30   : > { %s268_s12 = scalar_lea.hbm %s1582_s0, %s910_s13  ;;  %s1481_s14 = sshll.u32 %s257_s11, 4  ;;  %s273_s14 = int_to_ptr.vmem [resolvable:$true] %s1481_s14 }
  0x31   : > { %s270_s19 = sshll.u32 %s268_s12, 4  ;;  %s882_s21 = sshll.u32 %s1609_s27, 7  ;;  %s1484_s19 = int_to_ptr.hbm [resolvable:$true] %s270_s19 }
  0x32   : > { %s1185_s1 = sshra.s32 %s1484_s19, 4  ;;  %s1187_s18 = sshrl.u32 %s882_s21, 4  ;;  %s1186_s1 = int_to_ptr.hbm [resolvable:$true] %s1185_s1 }
  0x33   : > { %s1192_s20 = scalar_lea.hbm %s1186_s1, %s1187_s18  ;;  %s1196_s28 = scalar_lea.hbm %s1582_s0, 24 }
  0x34   : > { %p1193_p3 = scmp.ne.s32.totalorder %s1186_s1, %s1192_s20  ;;  %p1197_p7 = scmp.lt.s32.totalorder %s1186_s1, %s1582_s0 }
  0x35   : > { %p1198_p9 = scmp.lt.s32.totalorder %s1196_s28, %s1192_s20 }
  0x36   : > { %p1194_p4 = pnand %p1193_p3, %p1473_p2 }
  0x37   : > { %p1199_p12 = por %p1198_p9, %p1197_p7 }
  0x38   : > { %p1195_p6 = pneg %p1194_p4 }
  0x3a   : > { %p1200_p13 = pnand %p1199_p12, %p1195_p6 }
  0x3c   : > { %1203 = shalt.err (!%p1200_p13)
}
  0x3d   : > { %s1204_s13 = sshra.s32 %s273_s14, 4  ;;  %s1340_s17 = smov [#allocation2]   ;;  %s1205_s13 = int_to_ptr.vmem [resolvable:$true] %s1204_s13 }
  0x3e   : > { %s1211_s16 = scalar_lea.vmem %s1205_s13, %s1187_s18  ;;  %s1215_s12 = scalar_lea.vmem %s1340_s17, 32 }
  0x3f   : > { %p1212_p0 = scmp.ne.s32.totalorder %s1205_s13, %s1211_s16  ;;  %p1217_p4 = scmp.lt.s32.totalorder %s1215_s12, %s1211_s16 }
  0x41   : > { %p1213_p1 = pnand %p1212_p0, %p1473_p2 }
  0x43   : > { %p1214_p3 = pneg %p1213_p1 }
  0x45   : > { %p1219_p5 = pnand %p1217_p4, %p1214_p3 }
  0x47   : > { %1222 = shalt.err (!%p1219_p5)
}
  0x48   : > { %s1341_s1 = smov 128   ;;  %s1342_s20 = smov 8  }
  0x49   : > { %278 = dma.hbm_to_vmem [thread:$0]  (%p1473_p2), %s1484_s19, %s882_s21, %s273_s14, %s1470_s10, %s1341_s1, %s1341_s1, %s1342_s20  }
  0x4a PF: > { %284 = sbr.rel (%p1430_p11) target bundleno = 809 (0x329), region = 44  ;;  %s286_s18 = sand.u32 (!%p1430_p11), 1, %s1290_s22  }
  0x4b   : > { %s1513_s24 = sshll.u32 (!%p1430_p11), %s286_s18, 4  ;;  %s287_s4 = scalar_lea.sflag (!%p1430_p11), [#allocation3], %s286_s18 }
  0x4c   : > { %s290_s28 = scalar_lea.vmem (!%p1430_p11), [#allocation2], %s1513_s24 }
  0x4f   : > { %1273 = dma.done.wait (%p1421_p8), %s287_s4, 256  }
  0x50   : > { %1275 = vsyncadd (%p1421_p8), %s287_s4, 4294967040  ;;  %p1600_p5 = scmp.eq.s32.totalorder %s1397_s25, 0 }
  0x52   : > { %1277 = dma.done.wait (%p1600_p5), [#allocation5], 912   ;;  %p1601_p2 = pmov %p1600_p5 }
  0x54   : > { %1279 = vsyncadd (%p1601_p2), [#allocation5], 4294966384  ;;  %p1602_p11 = pmov %p1601_p2 }
  0x55   : > { %p1603_p6 = pmov %p1601_p2 }
  0x56   : > { %1281 = dma.done.wait (%p1602_p11), [#allocation8], 8272  }
  0x57   : > { %1283 = vsyncadd (%p1603_p6), [#allocation8], 4294959024  ;;  %vm383_vm0 = vcmask 1041408   ;;  %v371_v0 = vld [vmem:[#allocation6 + $0x30] sm:$0x3]  ;;  %v370_v1 = vld [vmem:[#allocation6 + $0x28] sm:$0xff] }
  0x58   : > { %890 = vmatpush.msk.msra.mxu0 %vm383_vm0, %v371_v0  ;;  %v369_v2 = vld [vmem:[#allocation6 + $0x20] sm:$0xff]  ;;  %v1058_v4 = vld [vmem:[#allocation4] ss:$0 sm:$0xff]  ;;  %v427_v7 = vld [vmem:[#allocation7 + $0x78] sm:$0xff]  ;;  %vm376_vm1 = vcmask 408576   ;;  %vm597_vm2 = vcmask 80896  }
  0x59   : > { %v349_v3 = vld [vmem:[%s290_s28] sm:$0xff]  ;;  %433 = vmatpush.msra.mxu1 %v427_v7  ;;  %v350_v13 = vld [vmem:[%s290_s28 + $0x8] sm:$0xff]  ;;  %s1534_s27 = scalar_lea.vmem [#allocation10], %s1513_s24   ;;  %s894_s10 = sshll.u32 (%p1426_p10), %s1397_s25, 1 }
  0x5a   : > { %397 = vmatpush.msra.mxu0 %v370_v1  ;;  %v1059_v5 = vld [vmem:[%s1584_s2] ss:$0 sm:$0xff]  ;;  %v426_v8 = vld [vmem:[#allocation7 + $0x70] sm:$0xff]  ;;  %v355_v9 = vmul.f32 %v1058_v4, %v349_v3  ;;  %v367_v10 = vld [vmem:[#allocation6 + $0x10] sm:$0xff]  ;;  %v356_v19 = vmul.f32 %v1058_v4, %v350_v13  ;;  %s911_s30 = sshll.u32 (%p1426_p10), %s1397_s25, 4  ;;  %s608_s14 = ssub.s32 (%p1426_p10), 3, %s894_s10 }
  0x5b   : > { %v368_v6 = vld [vmem:[#allocation6 + $0x18] sm:$0xff]  ;;  %v425_v11 = vld [vmem:[#allocation7 + $0x68] sm:$0xff]  ;;  %434 = vmatpush.msra.mxu1 %v426_v8  ;;  %v366_v14 = vld [vmem:[#allocation6 + $0x8] sm:$0xff]  ;;  %s1545_s15 = scalar_lea.vmem (%p1426_p10), %s1588_s6, %s911_s30   ;;  %p609_p8 = scmp.lt.s32.totalorder (%p1426_p10), %s608_s14, 2 }
  0x5c   : > { %398 = vmatpush.msra.mxu0 %v369_v2  ;;  %v361_v12 = vadd.f32 %v1059_v5, %v355_v9  ;;  %v424_v15 = vld [vmem:[#allocation7 + $0x60] sm:$0xff]  ;;  %v365_v16 = vld [vmem:[#allocation6] sm:$0xff]  ;;  %v423_v18 = vld [vmem:[#allocation7 + $0x58] sm:$0xff]  ;;  %v362_v21 = vadd.f32 %v1059_v5, %v356_v19 }
  0x5d   : > { %435 = vmatpush.msra.mxu1 %v425_v11  ;;  %v422_v20 = vld [vmem:[#allocation7 + $0x50] sm:$0xff]  ;;  %v421_v22 = vld [vmem:[#allocation7 + $0x48] sm:$0xff]  ;;  %v420_v23 = vld [vmem:[#allocation7 + $0x40] sm:$0xff] }
  0x5e   : > { %399 = vmatpush.msra.mxu0 %v368_v6  ;;  %v363_v17 = vmax.f32 %v361_v12, 0.0  ;;  %v364_v24 = vmax.f32 %v362_v21, 0.0  ;;  %v419_v25 = vld [vmem:[#allocation7 + $0x38] sm:$0xff]  ;;  %v418_v26 = vld [vmem:[#allocation7 + $0x30] sm:$0xff]  ;;  %v417_v27 = vld [vmem:[#allocation7 + $0x28] sm:$0xff] }
  0x5f   : > { %436 = vmatpush.msra.mxu1 %v424_v15  ;;  %v416_v28 = vld [vmem:[#allocation7 + $0x20] sm:$0xff]  ;;  %v415_v29 = vld [vmem:[#allocation7 + $0x18] sm:$0xff]  ;;  %v414_v30 = vld [vmem:[#allocation7 + $0x10] sm:$0xff] }
  0x60   : > { %400 = vmatpush.msra.mxu0 %v367_v10  ;;  %v413_v31 = vld [vmem:[#allocation7 + $0x8] sm:$0xff]  ;;  %v412_v32 = vld [vmem:[#allocation7] sm:$0xff]  ;;  %v474_v33 = vld [vmem:[#allocation7 + $0xf8] sm:$0xff] }
  0x61   : > { %437 = vmatpush.msra.mxu1 %v423_v18  ;;  %v473_v34 = vld [vmem:[#allocation7 + $0xf0] sm:$0xff]  ;;  %480 = vmatpush.msra.mxu2 %v474_v33  ;;  %v472_v35 = vld [vmem:[#allocation7 + $0xe8] sm:$0xff]  ;;  %v471_v36 = vld [vmem:[#allocation7 + $0xe0] sm:$0xff] }
  0x62   : > { %401 = vmatpush.msra.mxu0 %v366_v14  ;;  %v470_v37 = vld [vmem:[#allocation7 + $0xd8] sm:$0xff]  ;;  %v469_v38 = vld [vmem:[#allocation7 + $0xd0] sm:$0xff]  ;;  %v468_v39 = vld [vmem:[#allocation7 + $0xc8] sm:$0xff] }
  0x63   : > { %438 = vmatpush.msra.mxu1 %v422_v20  ;;  %481 = vmatpush.msra.mxu2 %v473_v34  ;;  %v467_v40 = vld [vmem:[#allocation7 + $0xc0] sm:$0xff]  ;;  %v466_v41 = vld [vmem:[#allocation7 + $0xb8] sm:$0xff]  ;;  %v465_v43 = vld [vmem:[#allocation7 + $0xb0] sm:$0xff] }
  0x64   : > { %402 = vmatpush.msra.mxu0 %v365_v16  ;;  %v1060_v42 = vld [vmem:[#allocation9] ss:$0 sm:$0xff]  ;;  %v464_v44 = vld [vmem:[#allocation7 + $0xa8] sm:$0xff]  ;;  %v462_v49 = vld [vmem:[#allocation7 + $0x98] sm:$0xff] }
  0x65   : > { %891 = vmatmul.msk.f32.vlgmr.msra.gmra.mxu0 %vm376_vm1, %v363_v17  ;;  %439 = vmatpush.msra.mxu1 %v421_v22  ;;  %v463_v47 = vld [vmem:[#allocation7 + $0xa0] sm:$0xff]  ;;  %v461_v53 = vld [vmem:[#allocation7 + $0x90] sm:$0xff]  ;;  %v460_v54 = vld [vmem:[#allocation7 + $0x88] sm:$0xff] }
  0x66   : > { %482 = vmatpush.msra.mxu2 %v472_v35  ;;  %v459_v55 = vld [vmem:[#allocation7 + $0x80] sm:$0xff]  ;;  %v521_v56 = vld [vmem:[#allocation7 + $0x178] sm:$0xff]  ;;  %v520_v57 = vld [vmem:[#allocation7 + $0x170] sm:$0xff] }
  0x67   : > { %440 = vmatpush.msra.mxu1 %v420_v23  ;;  %527 = vmatpush.msra.mxu3 %v521_v56  ;;  %v519_v58 = vld [vmem:[#allocation7 + $0x168] sm:$0xff]  ;;  %v518_v59 = vld [vmem:[#allocation7 + $0x160] sm:$0xff]  ;;  %v517_v60 = vld [vmem:[#allocation7 + $0x158] sm:$0xff] }
  0x68   : > { %483 = vmatpush.msra.mxu2 %v471_v36  ;;  %v516_v61 = vld [vmem:[#allocation7 + $0x150] sm:$0xff]  ;;  %v515_v62 = vld [vmem:[#allocation7 + $0x148] sm:$0xff]  ;;  %v514_v63 = vld [vmem:[#allocation7 + $0x140] sm:$0xff] }
  0x69   : > { %441 = vmatpush.msra.mxu1 %v419_v25  ;;  %528 = vmatpush.msra.mxu3 %v520_v57  ;;  %v513_v0 = vld [vmem:[#allocation7 + $0x138] sm:$0xff]  ;;  %v1061_v1 = vld [vmem:[#allocation9 + $0x1] ss:$0 sm:$0xff]  ;;  %v512_v2 = vld [vmem:[#allocation7 + $0x130] sm:$0xff] }
  0x6a   : > { %484 = vmatpush.msra.mxu2 %v470_v37  ;;  %v511_v3 = vld [vmem:[#allocation7 + $0x128] sm:$0xff]  ;;  %v510_v6 = vld [vmem:[#allocation7 + $0x120] sm:$0xff]  ;;  %v509_v8 = vld [vmem:[#allocation7 + $0x118] sm:$0xff] }
  0x6b   : > { %442 = vmatpush.msra.mxu1 %v418_v26  ;;  %529 = vmatpush.msra.mxu3 %v519_v58  ;;  %v508_v12 = vld [vmem:[#allocation7 + $0x110] sm:$0xff]  ;;  %v507_v13 = vld [vmem:[#allocation7 + $0x108] sm:$0xff]  ;;  %v506_v14 = vld [vmem:[#allocation7 + $0x100] sm:$0xff] }
  0x6c   : > { %485 = vmatpush.msra.mxu2 %v469_v38  ;;  %v568_v15 = vld [vmem:[#allocation7 + $0x1f8] sm:$0xff]  ;;  %v567_v16 = vld [vmem:[#allocation7 + $0x1f0] sm:$0xff]  ;;  %v566_v17 = vld [vmem:[#allocation7 + $0x1e8] sm:$0xff] }
  0x6d   : > { %892 = vmatmul.msk.f32.gmra.mxu0 %vm376_vm1, %v364_v24  ;;  %443 = vmatpush.msra.mxu1 %v417_v27  ;;  %v565_v18 = vld [vmem:[#allocation7 + $0x1e0] sm:$0xff]  ;;  %v564_v19 = vld [vmem:[#allocation7 + $0x1d8] sm:$0xff]  ;;  %v563_v20 = vld [vmem:[#allocation7 + $0x1d0] sm:$0xff] }
  0x6e   : > { %486 = vmatpush.msra.mxu2 %v468_v39  ;;  %530 = vmatpush.msra.mxu3 %v518_v59  ;;  %v562_v21 = vld [vmem:[#allocation7 + $0x1c8] sm:$0xff]  ;;  %v561_v22 = vld [vmem:[#allocation7 + $0x1c0] sm:$0xff]  ;;  %v560_v23 = vld [vmem:[#allocation7 + $0x1b8] sm:$0xff] }
  0x6f   : > { %444 = vmatpush.msra.mxu1 %v416_v28  ;;  %574 = vmatpush.msrb.mxu0 %v568_v15  ;;  %v1062_v24 = vld [vmem:[#allocation9 + $0x2] ss:$0 sm:$0xff]  ;;  %v559_v25 = vld [vmem:[#allocation7 + $0x1b0] sm:$0xff]  ;;  %v558_v26 = vld [vmem:[#allocation7 + $0x1a8] sm:$0xff] }
  0x70   : > { %487 = vmatpush.msra.mxu2 %v467_v40  ;;  %531 = vmatpush.msra.mxu3 %v517_v60  ;;  %v555_v35 = vld [vmem:[#allocation7 + $0x190] sm:$0xff]  ;;  %v554_v36 = vld [vmem:[#allocation7 + $0x188] sm:$0xff]  ;;  %v553_v37 = vld [vmem:[#allocation7 + $0x180] sm:$0xff] }
  0x71   : > { %445 = vmatpush.msra.mxu1 %v415_v29  ;;  %575 = vmatpush.msrb.mxu0 %v567_v16  ;;  %v557_v29 = vld [vmem:[#allocation7 + $0x1a0] sm:$0xff] }
  0x72   : > { %488 = vmatpush.msra.mxu2 %v466_v41  ;;  %532 = vmatpush.msra.mxu3 %v516_v61  ;;  %v1063_v38 = vld [vmem:[#allocation9 + $0x3] ss:$0 sm:$0xff] }
  0x73   : > { %446 = vmatpush.msra.mxu1 %v414_v30  ;;  %576 = vmatpush.msrb.mxu0 %v566_v17 }
  0x74   : > { %489 = vmatpush.msra.mxu2 %v465_v43  ;;  %533 = vmatpush.msra.mxu3 %v515_v62 }
  0x75   : > { %447 = vmatpush.msra.mxu1 %v413_v31  ;;  %577 = vmatpush.msrb.mxu0 %v565_v18  ;;  %v556_v31 = vld [vmem:[#allocation7 + $0x198] sm:$0xff] }
  0x76   : > { %490 = vmatpush.msra.mxu2 %v464_v44  ;;  %534 = vmatpush.msra.mxu3 %v514_v63 }
  0x77   : > { %448 = vmatpush.msra.mxu1 %v412_v32  ;;  %578 = vmatpush.msrb.mxu0 %v564_v19 }
  0x78   : > { %491 = vmatpush.msra.mxu2 %v463_v47  ;;  %535 = vmatpush.msra.mxu3 %v513_v0 }
  0x79   : > { %579 = vmatpush.msrb.mxu0 %v563_v20 }
  0x7a   : > { %492 = vmatpush.msra.mxu2 %v462_v49  ;;  %536 = vmatpush.msra.mxu3 %v512_v2 }
  0x7b   : > { %580 = vmatpush.msrb.mxu0 %v562_v21 }
  0x7c   : > { %493 = vmatpush.msra.mxu2 %v461_v53  ;;  %537 = vmatpush.msra.mxu3 %v511_v3 }
  0x7d   : > { %581 = vmatpush.msrb.mxu0 %v561_v22 }
  0x7e   : > { %494 = vmatpush.msra.mxu2 %v460_v54  ;;  %538 = vmatpush.msra.mxu3 %v510_v6 }
  0x7f   : > { %582 = vmatpush.msrb.mxu0 %v560_v23 }
  0x80   : > { %495 = vmatpush.msra.mxu2 %v459_v55  ;;  %539 = vmatpush.msra.mxu3 %v509_v8 }
  0x81   : > { %583 = vmatpush.msrb.mxu0 %v559_v25 }
  0x82   : > { %540 = vmatpush.msra.mxu3 %v508_v12 }
  0x83   : > { %584 = vmatpush.msrb.mxu0 %v558_v26 }
  0x84   : > { %541 = vmatpush.msra.mxu3 %v507_v13 }
  0x85   : > { %585 = vmatpush.msrb.mxu0 %v557_v29 }
  0x86   : > { %542 = vmatpush.msra.mxu3 %v506_v14 }
  0x87   : > { %586 = vmatpush.msrb.mxu0 %v556_v31 }
  0x89   : > { %587 = vmatpush.msrb.mxu0 %v555_v35 }
  0x8b   : > { %588 = vmatpush.msrb.mxu0 %v554_v36 }
  0x8d   : > { %589 = vmatpush.msrb.mxu0 %v553_v37 }
  0xe2   : > { %v404_v45 = vpop.f32.mrf.mxu0 }
  0xe3   : > { %v405_v46 = vadd.f32 %v1060_v42, %v404_v45  ;;  %v1064_v45 = vld [vmem:[#allocation9 + $0x4] ss:$0 sm:$0xff] }
  0xe5   : > { %v410_v48 = vmax.f32 %v405_v46, 0.0 }
  0xe7   : > { %449 = vmatmul.f32.vlgmr.msra.gmra.mxu1 %v410_v48 }
  0xea   : > { %v407_v50 = vpop.f32.mrf.mxu0 }
  0xeb   : > { %v408_v51 = vadd.f32 %v1060_v42, %v407_v50 }
  0xed   : > { %v411_v52 = vmax.f32 %v408_v51, 0.0 }
  0xef   : > { %452 = vmatmul.f32.gmra.mxu1 %v411_v52 }
 0x164   : > { %v450_v4 = vpop.f32.mrf.mxu1 }
 0x165   : > { %v451_v5 = vadd.f32 %v1061_v1, %v450_v4 }
 0x167   : > { %v456_v7 = vmax.f32 %v451_v5, 0.0 }
 0x169   : > { %496 = vmatmul.f32.vlgmr.msra.gmra.mxu2 %v456_v7 }
 0x16c   : > { %v453_v9 = vpop.f32.mrf.mxu1 }
 0x16d   : > { %v454_v10 = vadd.f32 %v1061_v1, %v453_v9 }
 0x16f   : > { %v457_v11 = vmax.f32 %v454_v10, 0.0 }
 0x171   : > { %499 = vmatmul.f32.gmra.mxu2 %v457_v11 }
 0x1ec   : > { %v497_v27 = vpop.f32.mrf.mxu2 }
 0x1ed   : > { %v498_v28 = vadd.f32 %v1062_v24, %v497_v27 }
 0x1ef   : > { %v503_v30 = vmax.f32 %v498_v28, 0.0 }
 0x1f1   : > { %543 = vmatmul.f32.vlgmr.msra.gmra.mxu3 %v503_v30 }
 0x1f4   : > { %v500_v32 = vpop.f32.mrf.mxu2 }
 0x1f5   : > { %v501_v33 = vadd.f32 %v1062_v24, %v500_v32 }
 0x1f7   : > { %v504_v34 = vmax.f32 %v501_v33, 0.0 }
 0x1f9   : > { %546 = vmatmul.f32.gmra.mxu3 %v504_v34 }
 0x274   : > { %v544_v39 = vpop.f32.mrf.mxu3 }
 0x275   : > { %v545_v40 = vadd.f32 %v1063_v38, %v544_v39 }
 0x277   : > { %v550_v41 = vmax.f32 %v545_v40, 0.0 }
 0x279   : > { %590 = vmatmul.f32.vlgmr.msrb.gmra.mxu0 %v550_v41 }
 0x27c   : > { %v547_v42 = vpop.f32.mrf.mxu3 }
 0x27d   : > { %v548_v43 = vadd.f32 %v1063_v38, %v547_v42 }
 0x27f   : > { %v551_v44 = vmax.f32 %v548_v43, 0.0 }
 0x281   : > { %593 = vmatmul.f32.gmra.mxu0 %v551_v44 }
 0x2f6   : > { %v591_v46 = vpop.f32.mrf.mxu0 }
 0x2f7   : > { %v592_v47 = vadd.f32 %v1064_v45, %v591_v46 }
 0x2f9   : > { %598 = vst.msk [vmem:[%s1534_s27] sm:$0xff] %vm597_vm2, %v592_v47 }
 0x2fd   : > { %606 = sbr.rel (!%p1426_p10) target bundleno = 809 (0x329), region = 68 }
 0x2fe   : > { %v594_v48 = vpop.f32.mrf.mxu0 }
 0x2ff   : > { %v595_v49 = vadd.f32 %v1064_v45, %v594_v48 }
 0x301   : > { %599 = vst.msk [vmem:[%s1534_s27 + $0x8] sm:$0xff] %vm597_vm2, %v595_v49 }
 0x302   : > { %s1611_s14 = smov (!%p609_p8, %s608_s14), 2 }
 0x303   : > { %s895_s11 = sshll.u32 %s1611_s14, 3 }
 0x304   : > { %p898_p7 = scmp.eq.s32.totalorder %s895_s11, 0 }
 0x305   : > { %s1551_s8 = sshrl.u32 (!%p898_p7), %s1611_s14, 1 }
 0x306   : > { %617 = sbr.rel (%p898_p7) target bundleno = 809 (0x329), region = 72  ;;  %p899_p10 = scmp.le.s32.totalorder (!%p898_p7), %s1551_s8, 0 }
 0x30b   : > { %786 = sbr.rel (%p899_p10) target bundleno = 792 (0x318), region = 161  ;;  %s1300_s25 = smov (!%p899_p10), %s1545_s15  }
 0x30c   : > { %s1304_s13 = smov (!%p899_p10), %s1534_s27   ;;  %s1308_s16 = smov (!%p899_p10), 0  }
 0x30d   : > { %s1312_s17 = smov (!%p899_p10), 0  }
 0x310 LB: >> { %v682_v50 = vld [vmem:[%s1306_s13] sm:$0xff]  ;;  %v684_v51 = vld [vmem:[%s1306_s13 + $0x8] sm:$0xff]  ;;  %s686_s12 = sadd.s32 1, %s1310_s16  ;;  %s676_s17 = sadd.s32 1, %s1314_s17   ;;  %s1314_s17 = sphi %s1312_s17, %s676_s17   ;;  %s1310_s16 = sphi %s1308_s16, %s1309_s16   ;;  %s1306_s13 = sphi %s1304_s13, %s691_s13   ;;  %s1302_s25 = sphi %s1300_s25, %s692_s25  }
 0x311   : >> { %683 = vst [vmem:[%s1302_s25] sm:$0xff] %v682_v50  ;;  %p687_p9 = scmp.ge.s32.totalorder %s686_s12, %s1551_s8  ;;  %p675_p12 = scmp.ge.s32.totalorder %s676_s17, %s1551_s8 }
 0x312   : >> { %685 = vst [vmem:[%s1302_s25 + $0x8] sm:$0xff] %v684_v51 }
 0x313   : >> { %s1613_s12 = smov (%p687_p9, %s686_s12), 0  ;;  %678 = sbr.rel (!%p675_p12) target bundleno = 784 (0x310), region = 167 }
 0x314   : >> { %s900_s1 = sshll.u32 %s1613_s12, 4  ;;  %s1309_s16 = smov %s1613_s12  }
 0x315   : >> { %s691_s13 = scalar_lea.vmem %s1534_s27, %s900_s1 [#allocation10]   ;;  %s692_s25 = scalar_lea.vmem %s1545_s15, %s900_s1  }
 0x318 PF: > { %s1561_s20 = sand.u32 1, %s1611_s14   ;;  %s912_s18 = sshll.u32 %s1551_s8, 4 }
 0x319   : > { %s697_s24 = scalar_lea.vmem %s1534_s27, %s912_s18 [#allocation10]   ;;  %s699_s4 = scalar_lea.vmem %s1545_s15, %s912_s18  }
 0x31a   : > { %p905_p13 = scmp.le.s32.totalorder %s1561_s20, 0 }
 0x31b   : > { %s1316_s28 = smov (!%p905_p13), %s699_s4   ;;  %s1320_s7 = smov (!%p905_p13), %s697_s24  }
 0x31c   : > { %800 = sbr.rel (%p905_p13) target bundleno = 809 (0x329), region = 172  ;;  %s1324_s9 = smov (!%p905_p13), 0  }
 0x31d   : > { %s1328_s10 = smov (!%p905_p13), 0  }
 0x321 LB: >> { %v709_v52 = vld [vmem:[%s1322_s7] sm:$0xff]  ;;  %s711_s30 = sadd.s32 1, %s1326_s9  ;;  %s703_s10 = sadd.s32 1, %s1330_s10   ;;  %s1330_s10 = sphi %s1328_s10, %s703_s10   ;;  %s1326_s9 = sphi %s1324_s9, %s1325_s9   ;;  %s1322_s7 = sphi %s1320_s7, %s716_s7   ;;  %s1318_s28 = sphi %s1316_s28, %s717_s28  }
 0x322   : >> { %710 = vst [vmem:[%s1318_s28] sm:$0xff] %v709_v52  ;;  %p712_p0 = scmp.ge.s32.totalorder %s711_s30, %s1561_s20  ;;  %p702_p1 = scmp.ge.s32.totalorder %s703_s10, %s1561_s20 }
 0x324   : >> { %s1615_s30 = smov (%p712_p0, %s711_s30), 0  ;;  %705 = sbr.rel (!%p702_p1) target bundleno = 801 (0x321), region = 178 }
 0x325   : >> { %s906_s27 = sshll.u32 %s1615_s30, 3  ;;  %s1325_s9 = smov %s1615_s30  }
 0x326   : >> { %s716_s7 = scalar_lea.vmem %s697_s24, %s906_s27 [#allocation10]   ;;  %s717_s28 = scalar_lea.vmem %s699_s4, %s906_s27  }
 0x329 PF: > { %p18_p3 = scmp.ge.s32.totalorder %s1400_s26, 4   ;;  %s1604_s21 = smov %s1290_s22 }
 0x32a   : > { %s1605_s22 = smov %s1294_s23  ;;  %s1606_s23 = smov %s1410_s29 }
 0x32b   : > { %s1607_s24 = smov %s1400_s26  ;;  %20 = sbr.rel (!%p18_p3) target bundleno = 8 (0x8), region = 189 }
 0x330   :  { %733 = vsyncpa [#allocation3], 1 }
 0x331   :  { %735 = vsyncpa [#allocation3 + $0x1], 1 }
 0x332   :  { %736 = vsyncpa [#allocation5], 1 }
 0x333   :  { %737 = vsyncpa [#allocation8], 1 }

</bundles_post_ra>
